<compile_context>
chip_gen: v7x
topology: tpu7x:2x2x1
jax: 0.10.0
libtpu: 0.0.40
codegen_flags: <defaults>
</compile_context>

<pallas_src>
import math
import numpy as np

import jax
import jax.numpy as jnp
from jax import lax
from jax.experimental import pallas as pl
from jax.experimental.pallas import tpu as pltpu


def _cdiv(a, b):
    return (a + b - 1) // b


def _round_up(a, b):
    return _cdiv(a, b) * b


def _make_mrl_kernel(*, tk, k_total, max_mid, resident_x, mask_tail):
    """Grid = (N-tile j [parallel], K-tile k [arbitrary, carries accumulator])."""
    # Contract the K axis of x (B, tk) with the K axis of W (tn, tk): x @ W.T
    # (trans_b matmul form — native on the MXU, no W transpose needed).
    cdims = (((1,), (1,)), ((), ()))

    def kernel(mid_cnt_ref, mid_off_ref, mid_slot_ref, end_emit_ref, end_slot_ref,
               x_ref, w_ref, b_ref, o_ref, acc_ref):
        k = pl.program_id(1)

        @pl.when(k == 0)
        def _():
            # Fold the bias into the accumulator init (no per-step VPU add).
            acc_ref[...] = jnp.broadcast_to(b_ref[...], acc_ref.shape).astype(jnp.float32)

        if resident_x:
            start = pl.multiple_of(k * tk, 128)
            x_t = x_ref[:, pl.ds(start, tk)]
        else:
            x_t = x_ref[...]
        w_t = w_ref[...]

        col = lax.broadcasted_iota(jnp.int32, (1, tk), 1)
        if mask_tail:
            # Zero columns beyond the largest nesting dim (covers both a partial
            # final K tile and any padding past the array edge).
            lim = jnp.minimum(k_total - k * tk, tk)
            keep = col < lim
            x_t = jnp.where(keep, x_t, jnp.zeros((), x_t.dtype))
            w_t = jnp.where(keep, w_t, jnp.zeros((), w_t.dtype))

        acc_prev = acc_ref[...]

        # Nesting boundaries strictly inside this K tile: emit the prefix with a
        # masked dot (handles arbitrary, non-128-aligned boundaries).
        def emit_mid(i, carry):
            p = mid_off_ref[k * max_mid + i]
            slot = mid_slot_ref[k * max_mid + i]
            xm = jnp.where(col < p, x_t, jnp.zeros((), x_t.dtype))
            part = lax.dot_general(xm, w_t, dimension_numbers=cdims,
                                   preferred_element_type=jnp.float32)
            o_ref[slot] = (acc_prev + part).astype(o_ref.dtype)
            return carry

        lax.fori_loop(0, mid_cnt_ref[k], emit_mid, 0)

        # Full-tile accumulate.
        acc_ref[...] = acc_prev + lax.dot_general(
            x_t, w_t, dimension_numbers=cdims, preferred_element_type=jnp.float32)

        # Boundary exactly at the end of this tile's valid range: emit the acc.
        @pl.when(end_emit_ref[k] == 1)
        def _():
            o_ref[end_slot_ref[k]] = acc_ref[...].astype(o_ref.dtype)

    return kernel


def matryoshka_linear(x, weight, bias, nesting_dims, *, tk=None, tn=None,
                      resident_x=None, w_buffers=3):
    """Efficient Matryoshka linear.

    Returns a stacked float32 array of shape (n_nest, B, out_dim) with
        out[i] = x[:, :d_i] @ weight[:, :d_i].T + bias.

    x:      (B, input_dim)        — streamed in its own dtype (pre-cast to bf16
    weight: (out_dim, input_dim)     ONCE outside this call for bf16 inference).
    bias:   (out_dim,)
    nesting_dims: strictly increasing ints, last one <= input_dim.  No
        alignment requirement (mid-tile boundaries are handled in-kernel).
    """
    x = jnp.asarray(x)
    weight = jnp.asarray(weight)
    B, D = x.shape
    N, Dw = weight.shape
    assert Dw == D
    dims = [int(d) for d in nesting_dims]
    n_nest = len(dims)
    assert n_nest >= 1 and dims[0] >= 1 and dims[-1] <= D
    assert all(dims[i] < dims[i + 1] for i in range(n_nest - 1))

    K_total = dims[-1]            # columns beyond the last nesting dim are unused

    # --- K tile: sized for the MXU / HBM burst, independent of nesting dims. --
    if tk is None:
        tk = min(512, _round_up(K_total, 128))
    assert tk % 128 == 0 and tk >= 128
    nK = _cdiv(K_total, tk)
    K_cover = nK * tk
    mask_tail = (K_cover != K_total)

    # --- N tile: lane-dense; >= 2 tiles when possible (megacore on v7x). ------
    if tn is None:
        cands = [c for c in (512, 256, 128) if N % c == 0 and N // c >= 2]
        tn = cands[0] if cands else N
    assert N % tn == 0
    nN = N // tn

    # --- Boundary tables (scalar-prefetched into SMEM). -----------------------
    tile_end = [min((kk + 1) * tk, K_total) for kk in range(nK)]
    end_emit = np.zeros(nK, np.int32)
    end_slot = np.zeros(nK, np.int32)
    mid = [[] for _ in range(nK)]
    for i, d in enumerate(dims):
        kk = (d - 1) // tk
        if d == tile_end[kk]:
            end_emit[kk] = 1
            end_slot[kk] = i
        else:
            mid[kk].append((d - kk * tk, i))
    max_mid = max(1, max(len(m) for m in mid))
    mid_cnt = np.array([len(m) for m in mid], np.int32)
    mid_off = np.zeros((nK, max_mid), np.int32)
    mid_slot = np.zeros((nK, max_mid), np.int32)
    for kk, lst in enumerate(mid):
        for ii, (p, s) in enumerate(lst):
            mid_off[kk, ii] = p
            mid_slot[kk, ii] = s

    # --- Keep x resident in VMEM for the whole grid when it fits. -------------
    xb = jnp.dtype(x.dtype).itemsize
    wb = jnp.dtype(weight.dtype).itemsize
    if resident_x is None:
        resident_x = B * K_cover * xb <= 8 * 2**20

    b2 = jnp.asarray(bias, dtype=jnp.float32).reshape(1, N)

    # --- VMEM budget + generation-aware limit. ---------------------------------
    w_bufs = int(w_buffers) if nK >= 3 else 2
    est = ((2 * B * K_cover * xb if resident_x else 2 * B * tk * xb)
           + w_bufs * tn * tk * wb
           + 2 * tn * 4
           + 2 * n_nest * B * tn * 4
           + B * tn * 4)
    try:
        vmem_cap = int(pltpu.get_tpu_info().vmem_capacity_bytes)
    except Exception:
        vmem_cap = 64 * 2**20            # conservative fallback (v7x-sized)
    vmem_limit = int(min((3 * vmem_cap) // 4, max(32 * 2**20, 2 * est)))

    kernel = _make_mrl_kernel(tk=tk, k_total=K_total, max_mid=max_mid,
                              resident_x=resident_x, mask_tail=mask_tail)

    if resident_x:
        x_spec = pl.BlockSpec((B, K_cover), lambda j, k, c, o, s, ee, es: (0, 0))
    else:
        x_spec = pl.BlockSpec((B, tk), lambda j, k, c, o, s, ee, es: (0, k))

    w_map = lambda j, k, c, o, s, ee, es: (j, k)
    w_spec = pl.BlockSpec((tn, tk), w_map)
    if w_bufs > 2:
        try:  # deeper buffering on the one big exposed DMA stream, if supported
            w_spec = pl.BlockSpec((tn, tk), w_map, pipeline_mode=pl.Buffered(w_bufs))
        except Exception:
            w_spec = pl.BlockSpec((tn, tk), w_map)

    out = pl.pallas_call(
        kernel,
        out_shape=jax.ShapeDtypeStruct((n_nest, B, N), jnp.float32),
        grid_spec=pltpu.PrefetchScalarGridSpec(
            num_scalar_prefetch=5,
            grid=(nN, nK),
            in_specs=[
                x_spec,                                                     # x
                w_spec,                                                     # W (torch layout)
                pl.BlockSpec((1, tn), lambda j, k, c, o, s, ee, es: (0, j)),  # bias
            ],
            out_specs=pl.BlockSpec(
                (n_nest, B, tn), lambda j, k, c, o, s, ee, es: (0, 0, j)),
            scratch_shapes=[pltpu.VMEM((B, tn), jnp.float32)],
        ),
        compiler_params=pltpu.CompilerParams(
            dimension_semantics=("parallel", "arbitrary"),
            vmem_limit_bytes=vmem_limit,
        ),
    )(jnp.asarray(mid_cnt), jnp.asarray(mid_off.reshape(-1)),
      jnp.asarray(mid_slot.reshape(-1)), jnp.asarray(end_emit),
      jnp.asarray(end_slot), x, weight, b2)

    return out


if __name__ == "__main__":
    # Shapes consistent with the module's forward: x is (batch, input_dim),
    # nesting_dims prefix-slice the feature axis.  (The PyTorch default
    # nesting_dims=None path is buggy — `list.append` returns None — so
    # explicit nesting_dims are used, matching intended usage.)
    B = 8
    input_dim = 384
    out_dim = 256
    nesting_dims = [128, 256, 384]

    key = jax.random.PRNGKey(0)
    kx, kw, kb = jax.random.split(key, 3)
    x = jax.random.normal(kx, (B, input_dim), dtype=jnp.float32)
    bound = 1.0 / math.sqrt(input_dim)
    weight = jax.random.uniform(kw, (out_dim, input_dim),
                                minval=-bound, maxval=bound, dtype=jnp.float32)
    bias = jax.random.uniform(kb, (out_dim,),
                              minval=-bound, maxval=bound, dtype=jnp.float32)

    def reference(d):
        return x[:, :d] @ weight[:, :d].T + bias

    # 1) Default f32 path — matches the PyTorch module's numerics.
    out = jax.block_until_ready(matryoshka_linear(x, weight, bias, nesting_dims))
    assert out.shape == (len(nesting_dims), B, out_dim)
    for i, d in enumerate(nesting_dims):
        assert jnp.allclose(out[i], reference(d), atol=2e-4, rtol=2e-4), f"f32 mismatch d={d}"

    # 2) bf16-streamed path: cast ONCE outside the wrapper (no per-call cast),
    #    f32 accumulation inside the kernel.
    x_bf = x.astype(jnp.bfloat16)
    w_bf = weight.astype(jnp.bfloat16)
    out_bf = jax.block_until_ready(matryoshka_linear(x_bf, w_bf, bias, nesting_dims))
    for i, d in enumerate(nesting_dims):
        assert jnp.allclose(out_bf[i], reference(d), atol=5e-2, rtol=5e-2), f"bf16 mismatch d={d}"

    # 3) Non-uniform nesting spacing + streamed (non-resident) x path.
    dims_nu = [128, 384]
    out_nu = jax.block_until_ready(
        matryoshka_linear(x, weight, bias, dims_nu, resident_x=False))
    for i, d in enumerate(dims_nu):
        assert jnp.allclose(out_nu[i], reference(d), atol=2e-4, rtol=2e-4), \
            f"non-uniform mismatch d={d}"

    # 4) Non-128-aligned nesting dims (mid-tile masked emits + K-tail masking).
    dims_na = [100, 256, 300]
    out_na = jax.block_until_ready(matryoshka_linear(x, weight, bias, dims_na))
    for i, d in enumerate(dims_na):
        assert jnp.allclose(out_na[i], reference(d), atol=2e-4, rtol=2e-4), \
            f"non-aligned mismatch d={d}"

    print("KERNEL_OK")
</pallas_src>

<mosaic_0001>
module attributes {stable_mosaic.version = 11 : i64} {
  func.func @kernel(%arg0: i32, %arg1: i32, %arg2: memref<1xi32, #tpu.memory_space<smem>>, %arg3: memref<2xi32, #tpu.memory_space<smem>>, %arg4: memref<2xi32, #tpu.memory_space<smem>>, %arg5: memref<1xi32, #tpu.memory_space<smem>>, %arg6: memref<1xi32, #tpu.memory_space<smem>>, %arg7: memref<8x384xf32, #tpu.memory_space<vmem>>, %arg8: memref<128x384xf32, #tpu.memory_space<vmem>>, %arg9: memref<1x128xf32, #tpu.memory_space<vmem>>, %arg10: memref<3x8x128xf32, #tpu.memory_space<vmem>>, %arg11: memref<8x128xf32, #tpu.memory_space<vmem>>) attributes {dimension_semantics = [#tpu.dimension_semantics<parallel>, #tpu.dimension_semantics<arbitrary>], iteration_bounds = array<i64: 2, 1>, scalar_prefetch = 5 : i64, scratch_operands = 1 : i64, tpu.core_type = #tpu.core_type<tc>, window_params = [{pipeline_mode = #tpu.pipeline_mode<synchronous>, transform_indices = @transform_0, window_bounds = array<i64: 8, 384>}, {transform_indices = @transform_1, window_bounds = array<i64: 128, 384>}, {transform_indices = @transform_2, window_bounds = array<i64: 1, 128>}, {transform_indices = @transform_3, window_bounds = array<i64: 3, 8, 128>}]} {
    %c0_i32 = arith.constant 0 : i32
    %0 = arith.cmpi eq, %arg1, %c0_i32 : i32
    %1 = arith.extui %0 : i1 to i32
    %c0_i32_0 = arith.constant 0 : i32
    %2 = arith.cmpi ne, %1, %c0_i32_0 : i32
    scf.if %2 {
      %c0_11 = arith.constant 0 : index
      %c0_12 = arith.constant 0 : index
      %22 = vector.load %arg9[%c0_11, %c0_12] : memref<1x128xf32, #tpu.memory_space<vmem>>, vector<1x128xf32>
      %23 = vector.shape_cast %22 : vector<1x128xf32> to vector<1x128xf32>
      %24 = vector.broadcast %23 : vector<1x128xf32> to vector<8x128xf32>
      %c0_13 = arith.constant 0 : index
      %c0_14 = arith.constant 0 : index
      %25 = vector.load %arg11[%c0_13, %c0_14] : memref<8x128xf32, #tpu.memory_space<vmem>>, vector<8x128xf32>
      tpu.vector_store %arg11[%c0_13, %c0_14], %24 {strides = array<i32>} : memref<8x128xf32, #tpu.memory_space<vmem>>, vector<8x128xf32>,
    } else {
    }
    %c384_i32 = arith.constant 384 : i32
    %3 = arith.muli %arg1, %c384_i32 : i32
    %4 = tpu.assume_multiple %3, 128 : i32
    %c0 = arith.constant 0 : index
    %5 = arith.index_cast %4 : i32 to index
    %6 = vector.load %arg7[%c0, %5] : memref<8x384xf32, #tpu.memory_space<vmem>>, vector<8x384xf32>
    %c0_1 = arith.constant 0 : index
    %c0_2 = arith.constant 0 : index
    %7 = vector.load %arg8[%c0_1, %c0_2] : memref<128x384xf32, #tpu.memory_space<vmem>>, vector<128x384xf32>
    %8 = tpu.iota {dimensions = array<i32: 1>} : vector<1x384xi32>
    %c0_3 = arith.constant 0 : index
    %c0_4 = arith.constant 0 : index
    %9 = vector.load %arg11[%c0_3, %c0_4] : memref<8x128xf32, #tpu.memory_space<vmem>>, vector<8x128xf32>
    %10 = arith.index_cast %arg1 : i32 to index
    %11 = memref.load %arg2[%10] : memref<1xi32, #tpu.memory_space<smem>>
    %c0_i32_5 = arith.constant 0 : i32
    %c0_i32_6 = arith.constant 0 : i32
    %12 = arith.subi %11, %c0_i32_6 : i32
    %13 = arith.addi %c0_i32_6, %12 : i32
    %c1_i32 = arith.constant 1 : i32
    scf.for %arg12 = %c0_i32_6 to %13 step %c1_i32  : i32 {
      %c2_i32 = arith.constant 2 : i32
      %22 = arith.muli %arg1, %c2_i32 : i32
      %23 = arith.addi %22, %arg12 : i32
      %24 = arith.index_cast %23 : i32 to index
      %25 = memref.load %arg3[%24] : memref<2xi32, #tpu.memory_space<smem>>
      %c2_i32_11 = arith.constant 2 : i32
      %26 = arith.muli %arg1, %c2_i32_11 : i32
      %27 = arith.addi %26, %arg12 : i32
      %28 = arith.index_cast %27 : i32 to index
      %29 = memref.load %arg4[%28] : memref<2xi32, #tpu.memory_space<smem>>
      %30 = vector.broadcast %25 : i32 to vector<1x384xi32>
      %31 = arith.cmpi slt, %8, %30 : vector<1x384xi32>
      %cst_12 = arith.constant 0.000000e+00 : f32
      %32 = vector.shape_cast %31 : vector<1x384xi1> to vector<1x384xi1>
      %33 = vector.broadcast %32 : vector<1x384xi1> to vector<8x384xi1>
      %34 = vector.broadcast %cst_12 : f32 to vector<8x384xf32>
      %35 = arith.select %33, %6, %34 : vector<8x384xi1>, vector<8x384xf32>
      %cst_13 = arith.constant dense<0.000000e+00> : vector<8x128xf32>
      %36 = tpu.matmul %35, %7, %cst_13 {dimension_numbers = #tpu.dot_dimension_numbers<[1], [1], [0], [0], [0, 0, 1, 0], [], []>} : vector<8x384xf32>, vector<128x384xf32>, vector<8x128xf32> -> vector<8x128xf32>
      %37 = arith.addf %9, %36 : vector<8x128xf32>
      %38 = arith.index_cast %29 : i32 to index
      %c0_14 = arith.constant 0 : index
      %c0_15 = arith.constant 0 : index
      %39 = vector.load %arg10[%38, %c0_14, %c0_15] : memref<3x8x128xf32, #tpu.memory_space<vmem>>, vector<1x8x128xf32>
      %40 = vector.shape_cast %39 : vector<1x8x128xf32> to vector<8x128xf32>
      %41 = vector.shape_cast %37 : vector<8x128xf32> to vector<1x8x128xf32>
      tpu.vector_store %arg10[%38, %c0_14, %c0_15], %41 {strides = array<i32>} : memref<3x8x128xf32, #tpu.memory_space<vmem>>, vector<1x8x128xf32>,
    }
    %cst = arith.constant dense<0.000000e+00> : vector<8x128xf32>
    %14 = tpu.matmul %6, %7, %cst {dimension_numbers = #tpu.dot_dimension_numbers<[1], [1], [0], [0], [0, 0, 1, 0], [], []>} : vector<8x384xf32>, vector<128x384xf32>, vector<8x128xf32> -> vector<8x128xf32>
    %15 = arith.addf %9, %14 : vector<8x128xf32>
    %c0_7 = arith.constant 0 : index
    %c0_8 = arith.constant 0 : index
    %16 = vector.load %arg11[%c0_7, %c0_8] : memref<8x128xf32, #tpu.memory_space<vmem>>, vector<8x128xf32>
    tpu.vector_store %arg11[%c0_7, %c0_8], %15 {strides = array<i32>} : memref<8x128xf32, #tpu.memory_space<vmem>>, vector<8x128xf32>,
    %17 = arith.index_cast %arg1 : i32 to index
    %18 = memref.load %arg5[%17] : memref<1xi32, #tpu.memory_space<smem>>
    %c1_i32_9 = arith.constant 1 : i32
    %19 = arith.cmpi eq, %18, %c1_i32_9 : i32
    %20 = arith.extui %19 : i1 to i32
    %c0_i32_10 = arith.constant 0 : i32
    %21 = arith.cmpi ne, %20, %c0_i32_10 : i32
    scf.if %21 {
      %c0_11 = arith.constant 0 : index
      %c0_12 = arith.constant 0 : index
      %22 = vector.load %arg11[%c0_11, %c0_12] : memref<8x128xf32, #tpu.memory_space<vmem>>, vector<8x128xf32>
      %23 = arith.index_cast %arg1 : i32 to index
      %24 = memref.load %arg6[%23] : memref<1xi32, #tpu.memory_space<smem>>
      %25 = arith.index_cast %24 : i32 to index
      %c0_13 = arith.constant 0 : index
      %c0_14 = arith.constant 0 : index
      %26 = vector.load %arg10[%25, %c0_13, %c0_14] : memref<3x8x128xf32, #tpu.memory_space<vmem>>, vector<1x8x128xf32>
      %27 = vector.shape_cast %26 : vector<1x8x128xf32> to vector<8x128xf32>
      %28 = vector.shape_cast %22 : vector<8x128xf32> to vector<1x8x128xf32>
      tpu.vector_store %arg10[%25, %c0_13, %c0_14], %28 {strides = array<i32>} : memref<3x8x128xf32, #tpu.memory_space<vmem>>, vector<1x8x128xf32>,
    } else {
    }
    return
  }
  func.func @transform_0(%arg0: i32, %arg1: i32, %arg2: memref<1xi32, #tpu.memory_space<smem>>, %arg3: memref<2xi32, #tpu.memory_space<smem>>, %arg4: memref<2xi32, #tpu.memory_space<smem>>, %arg5: memref<1xi32, #tpu.memory_space<smem>>, %arg6: memref<1xi32, #tpu.memory_space<smem>>) -> (i32, i32) {
    %c0_i32 = arith.constant 0 : i32
    %c0_i32_0 = arith.constant 0 : i32
    %c0_i32_1 = arith.constant 0 : i32
    return %c0_i32, %c0_i32_0 : i32, i32
  }
  func.func @transform_1(%arg0: i32, %arg1: i32, %arg2: memref<1xi32, #tpu.memory_space<smem>>, %arg3: memref<2xi32, #tpu.memory_space<smem>>, %arg4: memref<2xi32, #tpu.memory_space<smem>>, %arg5: memref<1xi32, #tpu.memory_space<smem>>, %arg6: memref<1xi32, #tpu.memory_space<smem>>) -> (i32, i32) {
    %c0_i32 = arith.constant 0 : i32
    return %arg0, %arg1 : i32, i32
  }
  func.func @transform_2(%arg0: i32, %arg1: i32, %arg2: memref<1xi32, #tpu.memory_space<smem>>, %arg3: memref<2xi32, #tpu.memory_space<smem>>, %arg4: memref<2xi32, #tpu.memory_space<smem>>, %arg5: memref<1xi32, #tpu.memory_space<smem>>, %arg6: memref<1xi32, #tpu.memory_space<smem>>) -> (i32, i32) {
    %c0_i32 = arith.constant 0 : i32
    %c0_i32_0 = arith.constant 0 : i32
    return %c0_i32, %arg0 : i32, i32
  }
  func.func @transform_3(%arg0: i32, %arg1: i32, %arg2: memref<1xi32, #tpu.memory_space<smem>>, %arg3: memref<2xi32, #tpu.memory_space<smem>>, %arg4: memref<2xi32, #tpu.memory_space<smem>>, %arg5: memref<1xi32, #tpu.memory_space<smem>>, %arg6: memref<1xi32, #tpu.memory_space<smem>>) -> (i32, i32, i32) {
    %c0_i32 = arith.constant 0 : i32
    %c0_i32_0 = arith.constant 0 : i32
    %c0_i32_1 = arith.constant 0 : i32
    return %c0_i32, %c0_i32_0, %arg0 : i32, i32, i32
  }
}

</mosaic_0001>

<bundles_post_ra>
// kernel: tpu_custom_call.1
= control target key start
LH: loop header
LB: loop body
LE: loop exit
PB: predicated region body
PF: predicated region fallthrough
CT: control target
= control target key end

     0   :  { %s1884_s0 = inlined_call_operand.<no memory space> [shape: s32[1], index: 0, kind: input, shape index: {}]   ;;  %s1885_s1 = inlined_call_operand.vmem [shape: s32[2], index: 1, kind: input, shape index: {}]   ;;  %s1886_s5 = inlined_call_operand.hbm [shape: f32[8,384], index: 5, kind: input, shape index: {}]   ;;  %s1887_s6 = inlined_call_operand.hbm [shape: f32[256,384], index: 6, kind: input, shape index: {}]   ;;  %s1888_s7 = inlined_call_operand.vmem [shape: f32[1,256], index: 7, kind: input, shape index: {}]   ;;  %s1889_s8 = inlined_call_operand.hbm [shape: f32[3,8,256], index: 8, kind: output, shape index: {}]   ;;  %s1890_s2 = inlined_call_operand.vmem [shape: s32[2], index: 2, kind: input, shape index: {}]   ;;  %s1891_s3 = inlined_call_operand.<no memory space> [shape: s32[1], index: 3, kind: input, shape index: {}]   ;;  %s1892_s4 = inlined_call_operand.<no memory space> [shape: s32[1], index: 4, kind: input, shape index: {}]  }
   0x1   :  { %13 = sst [smem:[#allocation4]] %s1884_s0  ;;  %s14_s9 = sshll.u32 %s1885_s1, 4  ;;  %s15_s9 = int_to_ptr.vmem [resolvable:$true] %s14_s9 }
   0x2   :  { %s18_s12 = sshll.u32 %s1890_s2, 4  ;;  %s1110_s13 = scalar_lea.vmem %s15_s9, 16  ;;  %s19_s12 = int_to_ptr.vmem [resolvable:$true] %s18_s12 }
   0x3   :  { %p1111_p0 = scmp.ne.s32.totalorder %s15_s9, %s1110_s13  ;;  %p1115_p1 = scmp.lt.s32.totalorder %s15_s9, %s15_s9 }
   0x4   :  { %p1116_p2 = scmp.lt.s32.totalorder %s1110_s13, %s1110_s13 }
   0x6   :  { %p1117_p3 = por %p1116_p2, %p1115_p1 }
   0x8   :  { %p1118_p4 = pnand %p1117_p3, %p1111_p0 }
   0xa   :  { %1121 = shalt.err (!%p1118_p4)  }
   0xb   :  { %s1290_s14 = smov [#allocation5]   ;;  %22 = sst [smem:[#allocation7]] %s1891_s3 }
   0xc   :  { %17 = dma.vmem_to_smem %s15_s9, 16, %s1290_s14, [#allocation3] }
   0xd   :  { %s1122_s1 = scalar_lea.vmem %s19_s12, 16  ;;  %p1127_p6 = scmp.lt.s32.totalorder %s19_s12, %s19_s12 }
   0xe   :  { %p1123_p5 = scmp.ne.s32.totalorder %s19_s12, %s1122_s1  ;;  %p1128_p7 = scmp.lt.s32.totalorder %s1122_s1, %s1122_s1 }
  0x10   :  { %p1129_p8 = por %p1128_p7, %p1127_p6 }
  0x12   :  { %p1130_p9 = pnand %p1129_p8, %p1123_p5 }
  0x14   :  { %1133 = shalt.err (!%p1130_p9)  }
  0x15   :  { %s1291_s2 = smov [#allocation6]   ;;  %23 = sst [smem:[#allocation8]] %s1892_s4 }
  0x16   :  { %21 = dma.vmem_to_smem %s19_s12, 16, %s1291_s2, [#allocation3] }
  0x17   :  { %1248 = dma.done.wait [#allocation3], 32 }
  0x18   :  { %1249 = vsyncadd [#allocation3], 4294967264 }
  0x19   :  { %25 = sfence }
  0x1a   :  { %26 = vsyncpa [#allocation10], 0 }
  0x1b   :  { %27 = vsyncpa [#allocation13], 0 }
  0x1c   :  { %29 = vsyncpa [#allocation13 + $0x1], 0 }
  0x1d   :  { %30 = vsyncpa [#allocation11], 0 }
  0x1e   :  { %32 = vsyncpa [#allocation11 + $0x1], 0  ;;  %s1366_s3 = smov 0   ;;  %s1368_s18 = smov 0  }
  0x1f   :  { %s1370_s19 = smov 0   ;;  %s1372_s20 = smov 0  }
  0x20   :  { %s1374_s21 = smov 0   ;;  %s1376_s22 = smov 0  }
  0x21 LB: > { %s775_s4 = sadd.s32 4294967295, %s1284_s22   ;;  %s776_s23 = sadd.s32 4294967294, %s1284_s22   ;;  %s1284_s22 = sphi %s1376_s22, %s38_s22   ;;  %s1280_s21 = sphi %s1374_s21, %s1923_s21   ;;  %s1276_s20 = sphi %s1372_s20, %s1922_s20   ;;  %s1272_s19 = sphi %s1370_s19, %s1921_s19   ;;  %s1268_s18 = sphi %s1368_s18, %s1920_s18   ;;  %s1264_s3 = sphi %s1366_s3, %s1919_s3  }
  0x22   : > { %s80_s24 = sadd.s32 1, %s1272_s19  ;;  %p87_p10 = scmp.ne.s32.totalorder %s1272_s19, %s1268_s18 }
  0x23   : > { %p88_p11 = scmp.eq.s32.totalorder %s1284_s22, 0  ;;  %p93_p12 = scmp.ne.s32.totalorder %s1268_s18, %s1264_s3 }
  0x24   : > { %p1404_p13 = scmp.eq.s32.totalorder %s775_s4, 0  ;;  %p143_p0 = scmp.eq.s32.totalorder %s775_s4, 1 }
  0x25   : > { %p1408_p1 = por %p88_p11, %p87_p10  ;;  %p149_p2 = scmp.eq.s32.totalorder %s776_s23, 1 }
  0x26   : > { %s1899_s25 = scalar_select %p1404_p13, 1, 0 }
  0x27   : > { %p1414_p3 = por %p1404_p13, %p93_p12  ;;  %p1418_p4 = por %p143_p0, %p87_p10 }
  0x28   : > { %p1422_p5 = por %p149_p2, %p93_p12  ;;  %p777_p6 = scmp.ge.s32.totalorder %s1284_s22, 1 }
  0x29   : > { %s1901_s27 = scalar_select %p1414_p3, 1, 0 }
  0x2a   : > { %s1902_s28 = scalar_select %p1418_p4, 1, 0 }
  0x2b   : > { %s1903_s29 = scalar_select %p1422_p5, 1, 0 }
  0x2c   : > { %p156_p7 = scmp.lt.s32.totalorder %s1284_s22, 3  ;;  %s1292_s9 = smov [#allocation9]  }
  0x2d   : > { %s169_s10 = sshll.u32 %s1292_s9, 4  ;;  %p1037_p11 = scmp.lt.s32.totalorder %s1284_s22, 2  ;;  %s170_s10 = int_to_ptr.vmem [resolvable:$true] %s169_s10 }
  0x2e   : > { %p1429_p9 = pnand %p777_p6, %p156_p7  ;;  %s50_s13 = sadd.s32 1, %s1280_s21 }
  0x2f   : > { %p1438_p0 = pnand %p1037_p11, %p1408_p1  ;;  %p1449_p2 = scmp.ge.s32.totalorder %s50_s13, 2 }
  0x30   : > { %s1904_s30 = scalar_select %p1429_p9, 1, 0 }
  0x31   : > { %p1024_p10 = pneg %p1429_p9  ;;  %s180_s0 = sand.u32 1, %s1272_s19  }
  0x32   : > { %s1905_s11 = scalar_select %p1438_p0, 1, 0 }
  0x33   : > { %p1444_p12 = pnand %p1024_p10, %p1404_p13  ;;  %s1134_s2 = scalar_lea.hbm %s1886_s5, 384 }
  0x34   : > { %s1907_s14 = scalar_select %p1449_p2, 1, 0 }
  0x35   : > { %p1135_p1 = scmp.ne.s32.totalorder %s1886_s5, %s1134_s2  ;;  %p1136_p6 = pneg %p1444_p12 }
  0x36   : > { %p1141_p10 = scmp.lt.u32.totalorder %s1134_s2, %s1886_s5 }
  0x37   : > { %p1137_p7 = pnand %p1136_p6, %p1135_p1 }
  0x39   : > { %p1138_p11 = pneg %p1137_p7 }
  0x3b   : > { %p1143_p8 = pnand %p1141_p10, %p1138_p11 }
  0x3d   : > { %1146 = shalt.err (!%p1143_p8)
}
  0x3e   : > { %s1147_s26 = scalar_lea.vmem %s170_s10, 384  ;;  %p1155_p13 = scmp.lt.s32.totalorder %s170_s10, %s170_s10 }
  0x3f   : > { %p1148_p5 = scmp.ne.s32.totalorder %s170_s10, %s1147_s26  ;;  %p1156_p9 = scmp.lt.s32.totalorder %s1147_s26, %s1147_s26 }
  0x41   : > { %p1150_p4 = pnand %p1148_p5, %p1136_p6  ;;  %p1157_p0 = por %p1156_p9, %p1155_p13 }
  0x43   : > { %p1151_p3 = pneg %p1150_p4 }
  0x45   : > { %p1158_p2 = pnand %p1157_p0, %p1151_p3 }
  0x47   : > { %1161 = shalt.err (!%p1158_p2)
}
  0x48   : > { %1027 = dma.hbm_to_vmem [thread:$0]  (!%p1444_p12), %s1886_s5, 384, %s170_s10, [#allocation10]  }
  0x49   : > { %p1908_p5 = scmp.ne.s32.totalorder %s1907_s14, 0  ;;  %s1012_s1 = smul.u32 384, %s180_s0 }
  0x4a   : > { %s1013_s16 = smul.u32 6144, %s1280_s21  ;;  %s1489_s14 = scalar_lea.sflag [#allocation13], %s180_s0 }
  0x4b   : > { %s1925_s13 = smov (%p1908_p5, %s50_s13), 0  ;;  %s184_s23 = scalar_lea.vmem [#allocation12], %s1012_s1 }
  0x4c   : > { %s75_s2 = ssub.s32 %s1280_s21, %s1925_s13  ;;  %s1480_s4 = scalar_lea.hbm %s1887_s6, %s1013_s16 }
  0x4d   : > { %p78_p13 = scmp.eq.s32.totalorder %s75_s2, 0  ;;  %s194_s26 = sshll.u32 %s184_s23, 4  ;;  %s1487_s26 = int_to_ptr.vmem [resolvable:$true] %s194_s26 }
  0x4e   : > { %s1162_s9 = scalar_lea.hbm %s1480_s4, 6144  ;;  %p1909_p4 = scmp.ne.s32.totalorder %s1905_s11, 0 }
  0x4f   : > { %s1485_s10 = scalar_select %p78_p13, %s1272_s19, %s80_s24  }
  0x50   : > { %p1163_p3 = scmp.ne.s32.totalorder %s1480_s4, %s1162_s9  ;;  %p1164_p8 = pneg %p1909_p4 }
  0x51   : > { %s1167_s1 = scalar_lea.hbm %s1887_s6, 12288  ;;  %p1168_p12 = scmp.lt.u32.totalorder %s1480_s4, %s1887_s6 }
  0x52   : > { %p1165_p9 = pnand %p1164_p8, %p1163_p3  ;;  %p1169_p2 = scmp.lt.u32.totalorder %s1167_s1, %s1162_s9 }
  0x53   : > { %p1171_p6 = scmp.lt.u32.totalorder %s1162_s9, %s1480_s4 }
  0x54   : > { %p1166_p0 = pneg %p1165_p9  ;;  %p1170_p1 = por %p1169_p2, %p1168_p12 }
  0x56   : > { %p1172_p7 = por %p1171_p6, %p1170_p1 }
  0x58   : > { %p1173_p11 = pnand %p1172_p7, %p1166_p0 }
  0x5a   : > { %1176 = shalt.err (!%p1173_p11)
}
  0x5b   : > { %s1177_s24 = scalar_lea.vmem %s1487_s26, 6144  ;;  %s1293_s0 = smov [#allocation12]  }
  0x5c   : > { %p1178_p10 = scmp.ne.s32.totalorder %s1487_s26, %s1177_s24  ;;  %s1182_s17 = sshll.u32 %s1293_s0, 4  ;;  %s1183_s17 = int_to_ptr.vmem [resolvable:$false] %s1182_s17 }
  0x5d   : > { %s1184_s23 = scalar_lea.vmem %s1183_s17, 12288  ;;  %p1185_p3 = scmp.lt.s32.totalorder %s1487_s26, %s1183_s17 }
  0x5e   : > { %p1180_p5 = pnand %p1178_p10, %p1164_p8  ;;  %p1186_p9 = scmp.lt.s32.totalorder %s1184_s23, %s1177_s24 }
  0x60   : > { %p1181_p13 = pneg %p1180_p5  ;;  %p1187_p12 = por %p1186_p9, %p1185_p3 }
  0x62   : > { %p1188_p2 = pnand %p1187_p12, %p1181_p13 }
  0x64   : > { %1191 = shalt.err (!%p1188_p2)
}
  0x65   : > { %s1294_s9 = smov 384   ;;  %s1295_s15 = smov 24  }
  0x66   : > { %1031 = dma.hbm_to_vmem [thread:$0]  (!%p1909_p4), %s1480_s4, 6144, %s1487_s26, %s1489_s14, %s1294_s9, %s1294_s9, %s1295_s15  }
  0x67   : > { %p1910_p8 = scmp.ne.s32.totalorder %s1904_s30, 0 }
  0x69   : > { %212 = sbr.rel (%p1910_p8) target bundleno = 740 (0x2e4), region = 32 }
  0x70   : > { %p1911_p0 = scmp.ne.s32.totalorder %s1899_s25, 0 }
  0x72   : > { %1251 = dma.done.wait (%p1911_p0), [#allocation10], 384  }
  0x73   : > { %1253 = vsyncadd (%p1911_p0), [#allocation10], 4294966912  ;;  %s1524_s2 = sand.u32 1, %s1268_s18   ;;  %p1912_p4 = scmp.ne.s32.totalorder %s1901_s27, 0 }
  0x74   : > { %s1014_s1 = smul.u32 384, %s1524_s2  ;;  %s219_s16 = scalar_lea.sflag [#allocation13], %s1524_s2 }
  0x76   : > { %s1528_s12 = scalar_lea.vmem [#allocation12], %s1014_s1 }
  0x77   : > { %1255 = dma.done.wait (%p1912_p4), %s219_s16, 6144  }
  0x78   : > { %1257 = vsyncadd (%p1912_p4), %s219_s16, 4294961152  ;;  %s1015_s25 = smul.u32 24, %s1524_s2  ;;  %v321_v0 = vlaneseq  ;;  %s1535_s30 = sld [smem:[#allocation4]]  ;;  %v1545_v4 = vld [vmem:[#allocation9] sm:$0xff]  ;;  %v1547_v5 = vld [vmem:[#allocation9 + $0x8] sm:$0xff] }
  0x79   : > { %v1549_v6 = vld [vmem:[#allocation9 + $0x10] sm:$0xff]  ;;  %v1552_v7 = vld [vmem:[%s1528_s12] sm:$0xff]  ;;  %v1555_v8 = vld [vmem:[%s1528_s12 + $0x8] sm:$0xff]  ;;  %p250_p1 = scmp.lt.s32.totalorder %s1276_s20, 1 }
  0x7a   : > { %v1537_v1 = vand.u32 127, %v321_v0  ;;  %v1558_v9 = vld [vmem:[%s1528_s12 + $0x10] sm:$0xff]  ;;  %v1561_v10 = vld [vmem:[%s1528_s12 + $0x18] sm:$0xff]  ;;  %v1564_v11 = vld [vmem:[%s1528_s12 + $0x20] sm:$0xff]  ;;  %s1705_s14 = scalar_lea.vmem [#allocation14], %s1015_s25 }
  0x7b   : > { %1913 = vst [vmem:[#allocation19_spill] sm:$0xff] %v1561_v10  ;;  %v1567_v12 = vld [vmem:[%s1528_s12 + $0x28] sm:$0xff]  ;;  %v1570_v13 = vld [vmem:[%s1528_s12 + $0x30] sm:$0xff]  ;;  %v1573_v14 = vld [vmem:[%s1528_s12 + $0x38] sm:$0xff]  ;;  %s251_s27 = scalar_select %p250_p1, %s1276_s20, 1 }
  0x7c   : > { %v1540_v2 = vadd.s32 128, %v1537_v1  ;;  %v1543_v3 = vadd.s32 256, %v1537_v1  ;;  %v1576_v15 = vld [vmem:[%s1528_s12 + $0x40] sm:$0xff]  ;;  %v1579_v16 = vld [vmem:[%s1528_s12 + $0x48] sm:$0xff]  ;;  %v1582_v17 = vld [vmem:[%s1528_s12 + $0x50] sm:$0xff] }
  0x7d   : > { %v1585_v18 = vld [vmem:[%s1528_s12 + $0x58] sm:$0xff]  ;;  %v1588_v19 = vld [vmem:[%s1528_s12 + $0x60] sm:$0xff]  ;;  %v1591_v20 = vld [vmem:[%s1528_s12 + $0x68] sm:$0xff]  ;;  %s252_s26 = scalar_lea.vmem %s1888_s7, %s251_s27 }
  0x7e   : > { %v1594_v21 = vld [vmem:[%s1528_s12 + $0x70] sm:$0xff]  ;;  %v1597_v22 = vld [vmem:[%s1528_s12 + $0x78] sm:$0xff]  ;;  %v1600_v23 = vld [vmem:[%s1528_s12 + $0x80] sm:$0xff]  ;;  %p786_p6 = scmp.le.s32.totalorder %s1535_s30, 0 }
  0x7f   : > { %v1603_v24 = vld [vmem:[%s1528_s12 + $0x88] sm:$0xff]  ;;  %v1607_v25 = vld [vmem:[%s1528_s12 + $0x90] sm:$0xff]  ;;  %v1610_v26 = vld [vmem:[%s1528_s12 + $0x98] sm:$0xff]  ;;  %s1708_s24 = smov (!%p786_p6), 0  }
  0x80   : > { %v1613_v27 = vld [vmem:[%s1528_s12 + $0xa0] sm:$0xff]  ;;  %v1616_v28 = vld [vmem:[%s1528_s12 + $0xa8] sm:$0xff]  ;;  %v1619_v29 = vld [vmem:[%s1528_s12 + $0xb0] sm:$0xff] }
  0x81   : > { %v1622_v30 = vld [vmem:[%s1528_s12 + $0xb8] sm:$0xff]  ;;  %v1625_v31 = vld [vmem:[%s1528_s12 + $0xc0] sm:$0xff]  ;;  %v1628_v32 = vld [vmem:[%s1528_s12 + $0xc8] sm:$0xff] }
  0x82   : > { %v1631_v33 = vld [vmem:[%s1528_s12 + $0xd0] sm:$0xff]  ;;  %v1634_v34 = vld [vmem:[%s1528_s12 + $0xd8] sm:$0xff]  ;;  %v1637_v35 = vld [vmem:[%s1528_s12 + $0xe0] sm:$0xff] }
  0x83   : > { %v1640_v36 = vld [vmem:[%s1528_s12 + $0xe8] sm:$0xff]  ;;  %v1644_v37 = vld [vmem:[%s1528_s12 + $0xf0] sm:$0xff]  ;;  %v1647_v38 = vld [vmem:[%s1528_s12 + $0xf8] sm:$0xff] }
  0x84   : > { %v1650_v39 = vld [vmem:[%s1528_s12 + $0x100] sm:$0xff]  ;;  %v1653_v40 = vld [vmem:[%s1528_s12 + $0x108] sm:$0xff]  ;;  %v1656_v41 = vld [vmem:[%s1528_s12 + $0x110] sm:$0xff]  ;;  %725 = sbr.rel (%p786_p6) target bundleno = 422 (0x1a6), region = 97 }
  0x85   : > { %v1659_v42 = vld [vmem:[%s1528_s12 + $0x118] sm:$0xff]  ;;  %v1662_v43 = vld [vmem:[%s1528_s12 + $0x120] sm:$0xff]  ;;  %v1665_v44 = vld [vmem:[%s1528_s12 + $0x128] sm:$0xff] }
  0x86   : > { %v1668_v45 = vld [vmem:[%s1528_s12 + $0x130] sm:$0xff]  ;;  %v1671_v46 = vld [vmem:[%s1528_s12 + $0x138] sm:$0xff]  ;;  %v1674_v47 = vld [vmem:[%s1528_s12 + $0x140] sm:$0xff] }
  0x87   : > { %v1677_v48 = vld [vmem:[%s1528_s12 + $0x148] sm:$0xff]  ;;  %v1683_v49 = vld [vmem:[%s1528_s12 + $0x150] sm:$0xff]  ;;  %v1686_v50 = vld [vmem:[%s1528_s12 + $0x158] sm:$0xff] }
  0x88   : > { %v1689_v51 = vld [vmem:[%s1528_s12 + $0x160] sm:$0xff]  ;;  %v1692_v52 = vld [vmem:[%s1528_s12 + $0x168] sm:$0xff]  ;;  %v1695_v53 = vld [vmem:[%s1528_s12 + $0x170] sm:$0xff] }
  0x89   : > { %v1698_v54 = vld [vmem:[%s1528_s12 + $0x178] sm:$0xff]  ;;  %v1700_v55 = vld [vmem:[%s252_s26] ss:$0 sm:$0xff] }
  0x8a   : > { %264 = vst [vmem:[#allocation2] sm:$0xff] %v1700_v55 }
  0x8b LB: >> { %v900_v56 = vpack.c.bf16 %v1564_v11, %v1555_v8  ;;  %v933_v57 = vpack.c.bf16 %v1567_v12, %v1558_v9  ;;  %v1914_v10 = vld [vmem:[#allocation19_spill] sm:$0xff]  ;;  %v1296_v59 = vmov 0.0|0.0   ;;  %v904_v60 = vpack.c.bf16 %v1582_v17, %v1573_v14  ;;  %s335_s0 = sld [smem:[#allocation5 + %s1288_s24]]  ;;  %s1288_s24 = sphi %s1708_s24, %s330_s24  }
  0x8c   : >> { %v902_v58 = vpack.c.bf16 %v1914_v10, %v1552_v7  ;;  %932 = vmatprep.subr.bf16.mxu1 %v1296_v59  ;;  %vm1297_vm0 = vmmov 0   ;;  %v1298_v61 = vmov 0.0   ;;  %v936_v62 = vpack.c.bf16 %v1585_v18, %v1576_v15  ;;  %s336_s17 = sld [smem:[#allocation6 + %s1288_s24]]  ;;  %s330_s24 = sadd.s32 1, %s1288_s24  }
  0x8d   : >> { %901 = vmatprep.subr.bf16.mxu0 %v900_v56  ;;  %934 = vmatpush3.bf16.xpose.msra.mxu1 %v933_v57  ;;  %v906_v63 = vpack.c.bf16 %v1579_v16, %v1570_v13  ;;  %v908_v0 = vpack.c.bf16 %v1600_v23, %v1591_v20  ;;  %v939_v56 = vpack.c.bf16 %v1603_v24, %v1594_v21  ;;  %p329_p7 = scmp.ge.s32.totalorder %s330_s24, %s1535_s30 }
  0x8e   : >> { %903 = vmatpush1.bf16.xpose.msra.mxu0 %v902_v58  ;;  %935 = vmatprep.subr.bf16.mxu1 %v1296_v59  ;;  %v910_v57 = vpack.c.bf16 %v1597_v22, %v1588_v19  ;;  %v912_v58 = vpack.c.bf16 %v1619_v29, %v1610_v26 }
  0x8f   : >> { %905 = vmatprep.subr.bf16.mxu0 %v904_v60  ;;  %862 = vmatprep.mubr.msk.f32.mxu1 %vm1297_vm0, %v1298_v61  ;;  %v942_v60 = vpack.c.bf16 %v1622_v30, %v1613_v27  ;;  %v914_v61 = vpack.c.bf16 %v1616_v28, %v1607_v25 }
  0x91   : >> { %v337_v10 = vstv %s335_s0 }
  0x92   : >> { %vm339_vm1 = vcmp.lt.s32.totalorder %v1540_v2, %v337_v10  ;;  %vm340_vm2 = vcmp.lt.s32.totalorder %v1543_v3, %v337_v10  ;;  %vm338_vm3 = vcmp.lt.s32.totalorder %v1537_v1, %v337_v10  ;;  %s790_s23 = sshll.u32 %s336_s17, 3 }
  0x93   : >> { %787 = vmatprep.mubr.msk.f32.mxu0 %vm339_vm1, %v1547_v5  ;;  %s492_s9 = scalar_lea.vmem %s1705_s14, %s790_s23 [#allocation14] }
  0x95   : >> { %937 = vmatpush3.bf16.xpose.msra.mxu1 %v936_v62  ;;  %v916_v62 = vpack.c.bf16 %v1637_v35, %v1628_v32 }
  0x96   : >> { %907 = vmatpush1.bf16.xpose.msra.mxu0 %v906_v63  ;;  %938 = vmatprep.subr.bf16.mxu1 %v1296_v59  ;;  %v945_v63 = vpack.c.bf16 %v1640_v36, %v1631_v33 }
  0x97   : >> { %909 = vmatprep.subr.bf16.mxu0 %v908_v0  ;;  %v918_v0 = vpack.c.bf16 %v1634_v34, %v1625_v31 }
  0x9d   : >> { %940 = vmatpush3.bf16.xpose.msra.mxu1 %v939_v56  ;;  %v920_v56 = vpack.c.bf16 %v1656_v41, %v1647_v38 }
  0x9e   : >> { %911 = vmatpush1.bf16.xpose.msra.mxu0 %v910_v57  ;;  %941 = vmatprep.subr.bf16.mxu1 %v1296_v59  ;;  %v948_v57 = vpack.c.bf16 %v1659_v42, %v1650_v39 }
  0x9f   : >> { %913 = vmatprep.subr.bf16.mxu0 %v912_v58  ;;  %v922_v58 = vpack.c.bf16 %v1653_v40, %v1644_v37 }
  0xa5   : >> { %943 = vmatpush3.bf16.xpose.msra.mxu1 %v942_v60  ;;  %v924_v60 = vpack.c.bf16 %v1674_v47, %v1665_v44 }
  0xa6   : >> { %915 = vmatpush1.bf16.xpose.msra.mxu0 %v914_v61  ;;  %944 = vmatprep.subr.bf16.mxu1 %v1296_v59  ;;  %v951_v61 = vpack.c.bf16 %v1677_v48, %v1668_v45 }
  0xa7   : >> { %917 = vmatprep.subr.bf16.mxu0 %v916_v62  ;;  %v926_v62 = vpack.c.bf16 %v1671_v46, %v1662_v43 }
  0xad   : >> { %946 = vmatpush3.bf16.xpose.msra.mxu1 %v945_v63  ;;  %v928_v63 = vpack.c.bf16 %v1695_v53, %v1686_v50 }
  0xae   : >> { %919 = vmatpush1.bf16.xpose.msra.mxu0 %v918_v0  ;;  %947 = vmatprep.subr.bf16.mxu1 %v1296_v59  ;;  %v954_v0 = vpack.c.bf16 %v1698_v54, %v1689_v51 }
  0xaf   : >> { %921 = vmatprep.subr.bf16.mxu0 %v920_v56  ;;  %v930_v56 = vpack.c.bf16 %v1692_v52, %v1683_v49 }
  0xb5   : >> { %949 = vmatpush3.bf16.xpose.msra.mxu1 %v948_v57 }
  0xb6   : >> { %923 = vmatpush1.bf16.xpose.msra.mxu0 %v922_v58  ;;  %950 = vmatprep.subr.bf16.mxu1 %v1296_v59 }
  0xb7   : >> { %925 = vmatprep.subr.bf16.mxu0 %v924_v60 }
  0xbd   : >> { %952 = vmatpush3.bf16.xpose.msra.mxu1 %v951_v61 }
  0xbe   : >> { %927 = vmatpush1.bf16.xpose.msra.mxu0 %v926_v62  ;;  %953 = vmatprep.subr.bf16.mxu1 %v1296_v59 }
  0xbf   : >> { %929 = vmatprep.subr.bf16.mxu0 %v928_v63 }
  0xc5   : >> { %955 = vmatpush3.bf16.xpose.msra.mxu1 %v954_v0 }
  0xc6   : >> { %931 = vmatpush1.bf16.xpose.msra.mxu0 %v930_v56 }
  0xcc   : >> { %863 = vmatmul.mubr.msk.f32.vlgmr.msra.gmra.mrb[0].mxu1 %vm340_vm2, %v1549_v6 }
  0xcd   : >> { %788 = vmatmul.mubr.msk.f32.vlgmr.msra.gmra.mrb[0].mxu0 %vm338_vm3, %v1545_v4 }
 0x19f   : >> { %v486_v59 = vpop.f32.mrb[0].mxu1  ;;  %332 = sbr.rel (!%p329_p7) target bundleno = 139 (0x8b), region = 103 }
 0x1a0   : >> { %v416_v57 = vpop.f32.mrb[0].mxu0  ;;  %v864_v58 = vpop.f32.mrb[1].mxu1 }
 0x1a1   : >> { %v487_v60 = vadd.f32 %v486_v59, %v416_v57  ;;  %v418_v61 = vpop.f32.mrb[1].mxu0 }
 0x1a3   : >> { %v490_v62 = vadd.f32 %v1700_v55, %v487_v60 }
 0x1a5   : >> { %493 = vst [vmem:[%s492_s9] sm:$0xff] %v490_v62 }
 0x1a6 PF: > { %v956_v10 = vpack.c.bf16 %v1564_v11, %v1555_v8  ;;  %v989_v63 = vpack.c.bf16 %v1567_v12, %v1558_v9  ;;  %v1915_v0 = vld [vmem:[#allocation19_spill] sm:$0xff]  ;;  %558 = vmatprep.mubr.f32.mxu0 %v1547_v5  ;;  %v1299_v59 = vmov 0.0|0.0   ;;  %v960_v57 = vpack.c.bf16 %v1582_v17, %v1573_v14  ;;  %s636_s15 = sld [smem:[#allocation7]] }
 0x1a7   : > { %v958_v56 = vpack.c.bf16 %v1915_v0, %v1552_v7  ;;  %988 = vmatprep.subr.bf16.mxu1 %v1299_v59  ;;  %vm1300_vm4 = vmmov 0   ;;  %v1301_v1 = vmov 0.0   ;;  %v992_v2 = vpack.c.bf16 %v1585_v18, %v1576_v15 }
 0x1a8   : > { %957 = vmatprep.subr.bf16.mxu0 %v956_v10  ;;  %990 = vmatpush3.bf16.xpose.msra.mxu1 %v989_v63  ;;  %v962_v3 = vpack.c.bf16 %v1579_v16, %v1570_v13  ;;  %v964_v5 = vpack.c.bf16 %v1600_v23, %v1591_v20  ;;  %v995_v7 = vpack.c.bf16 %v1603_v24, %v1594_v21 }
 0x1a9   : > { %959 = vmatpush1.bf16.xpose.msra.mxu0 %v958_v56  ;;  %991 = vmatprep.subr.bf16.mxu1 %v1299_v59  ;;  %v966_v8 = vpack.c.bf16 %v1597_v22, %v1588_v19  ;;  %v968_v9 = vpack.c.bf16 %v1619_v29, %v1610_v26  ;;  %v998_v11 = vpack.c.bf16 %v1622_v30, %v1613_v27 }
 0x1aa   : > { %961 = vmatprep.subr.bf16.mxu0 %v960_v57  ;;  %897 = vmatprep.mubr.msk.f32.mxu1 %vm1300_vm4, %v1301_v1  ;;  %v970_v12 = vpack.c.bf16 %v1616_v28, %v1607_v25  ;;  %v972_v13 = vpack.c.bf16 %v1637_v35, %v1628_v32  ;;  %v1001_v14 = vpack.c.bf16 %v1640_v36, %v1631_v33 }
 0x1ab   : > { %v974_v15 = vpack.c.bf16 %v1634_v34, %v1625_v31  ;;  %v976_v16 = vpack.c.bf16 %v1656_v41, %v1647_v38  ;;  %v1004_v17 = vpack.c.bf16 %v1659_v42, %v1650_v39  ;;  %v978_v18 = vpack.c.bf16 %v1653_v40, %v1644_v37 }
 0x1ac   : > { %v980_v19 = vpack.c.bf16 %v1674_v47, %v1665_v44  ;;  %v1007_v20 = vpack.c.bf16 %v1677_v48, %v1668_v45  ;;  %v982_v21 = vpack.c.bf16 %v1671_v46, %v1662_v43  ;;  %v984_v22 = vpack.c.bf16 %v1695_v53, %v1686_v50  ;;  %p791_p11 = scmp.ne.s32.totalorder %s636_s15, 1 }
 0x1ad   : > { %v1010_v23 = vpack.c.bf16 %v1698_v54, %v1689_v51  ;;  %v986_v24 = vpack.c.bf16 %v1692_v52, %v1683_v49  ;;  %s642_s1 = sld [smem:[#allocation8]] (!%p791_p11) }
 0x1b0   : > { %993 = vmatpush3.bf16.xpose.msra.mxu1 %v992_v2 }
 0x1b1   : > { %963 = vmatpush1.bf16.xpose.msra.mxu0 %v962_v3  ;;  %994 = vmatprep.subr.bf16.mxu1 %v1299_v59 }
 0x1b2   : > { %965 = vmatprep.subr.bf16.mxu0 %v964_v5 }
 0x1b3   : > { %s792_s16 = sshll.u32 (!%p791_p11), %s642_s1, 3 }
 0x1b4   : > { %s644_s12 = scalar_lea.vmem (!%p791_p11), %s1705_s14, %s792_s16 [#allocation14] }
 0x1b8   : > { %996 = vmatpush3.bf16.xpose.msra.mxu1 %v995_v7 }
 0x1b9   : > { %967 = vmatpush1.bf16.xpose.msra.mxu0 %v966_v8  ;;  %997 = vmatprep.subr.bf16.mxu1 %v1299_v59 }
 0x1ba   : > { %969 = vmatprep.subr.bf16.mxu0 %v968_v9 }
 0x1c0   : > { %999 = vmatpush3.bf16.xpose.msra.mxu1 %v998_v11 }
 0x1c1   : > { %971 = vmatpush1.bf16.xpose.msra.mxu0 %v970_v12  ;;  %1000 = vmatprep.subr.bf16.mxu1 %v1299_v59 }
 0x1c2   : > { %973 = vmatprep.subr.bf16.mxu0 %v972_v13 }
 0x1c8   : > { %1002 = vmatpush3.bf16.xpose.msra.mxu1 %v1001_v14 }
 0x1c9   : > { %975 = vmatpush1.bf16.xpose.msra.mxu0 %v974_v15  ;;  %1003 = vmatprep.subr.bf16.mxu1 %v1299_v59 }
 0x1ca   : > { %977 = vmatprep.subr.bf16.mxu0 %v976_v16 }
 0x1d0   : > { %1005 = vmatpush3.bf16.xpose.msra.mxu1 %v1004_v17 }
 0x1d1   : > { %979 = vmatpush1.bf16.xpose.msra.mxu0 %v978_v18  ;;  %1006 = vmatprep.subr.bf16.mxu1 %v1299_v59 }
 0x1d2   : > { %981 = vmatprep.subr.bf16.mxu0 %v980_v19 }
 0x1d8   : > { %1008 = vmatpush3.bf16.xpose.msra.mxu1 %v1007_v20 }
 0x1d9   : > { %983 = vmatpush1.bf16.xpose.msra.mxu0 %v982_v21  ;;  %1009 = vmatprep.subr.bf16.mxu1 %v1299_v59 }
 0x1da   : > { %985 = vmatprep.subr.bf16.mxu0 %v984_v22 }
 0x1e0   : > { %1011 = vmatpush3.bf16.xpose.msra.mxu1 %v1010_v23 }
 0x1e1   : > { %987 = vmatpush1.bf16.xpose.msra.mxu0 %v986_v24 }
 0x1e7   : > { %898 = vmatmul.mubr.f32.vlgmr.msra.gmra.mrb[0].mxu1 %v1549_v6 }
 0x1e8   : > { %559 = vmatmul.mubr.f32.vlgmr.msra.gmra.mrb[0].mxu0 %v1545_v4 }
 0x2ba   : > { %v630_v25 = vpop.f32.mrb[0].mxu1  ;;  %640 = sbr.rel (%p791_p11) target bundleno = 713 (0x2c9), region = 55 }
 0x2bb   : > { %v560_v26 = vpop.f32.mrb[0].mxu0  ;;  %v899_v27 = vpop.f32.mrb[1].mxu1 }
 0x2bc   : > { %v631_v28 = vadd.f32 %v630_v25, %v560_v26  ;;  %v562_v29 = vpop.f32.mrb[1].mxu0 }
 0x2be   : > { %v634_v30 = vadd.f32 %v1700_v55, %v631_v28 }
 0x2c0   : > { %635 = vst [vmem:[#allocation2] sm:$0xff] %v634_v30 }
 0x2c7   : > { %v641_v31 = vld [vmem:[#allocation2] sm:$0xff] }
 0x2c8   : > { %645 = vst [vmem:[%s644_s12] sm:$0xff] %v641_v31 }
 0x2c9 PF: > { %s793_s25 = sshll.u32 %s1276_s20, 7  ;;  %s659_s4 = sshll.u32 %s1705_s14, 4  ;;  %s1835_s4 = int_to_ptr.vmem [resolvable:$true] %s659_s4 }
 0x2ca   : > { %s1832_s11 = scalar_lea.hbm %s1889_s8, %s793_s25  ;;  %s647_s26 = scalar_lea.sflag [#allocation11], %s1524_s2 }
 0x2cb   : > { %s1192_s24 = scalar_lea.vmem %s1835_s4, 384  ;;  %p1916_p5 = scmp.ne.s32.totalorder %s1902_s28, 0 }
 0x2cc   : > { %p1193_p10 = scmp.ne.s32.totalorder %s1835_s4, %s1192_s24  ;;  %s1302_s0 = smov [#allocation14]  }
 0x2cd   : > { %s1196_s17 = sshll.u32 %s1302_s0, 4  ;;  %s1197_s17 = int_to_ptr.vmem [resolvable:$false] %s1196_s17 }
 0x2ce   : > { %p1194_p13 = pnand %p1193_p10, %p1916_p5  ;;  %s1198_s20 = scalar_lea.vmem %s1197_s17, 768 }
 0x2cf   : > { %p1199_p9 = scmp.lt.s32.totalorder %s1835_s4, %s1197_s17  ;;  %p1200_p12 = scmp.lt.s32.totalorder %s1198_s20, %s1192_s24 }
 0x2d0   : > { %p1195_p3 = pneg %p1194_p13 }
 0x2d1   : > { %p1201_p2 = por %p1200_p12, %p1199_p9 }
 0x2d3   : > { %p1202_p8 = pnand %p1201_p2, %p1195_p3 }
 0x2d5   : > { %1205 = shalt.err (!%p1202_p8)
}
 0x2d6   : > { %s1206_s14 = scalar_lea.hbm %s1832_s11, 384  ;;  %s1210_s15 = scalar_lea.hbm %s1889_s8, 768 }
 0x2d7   : > { %p1207_p0 = scmp.ne.s32.totalorder %s1832_s11, %s1206_s14  ;;  %p1211_p6 = scmp.lt.u32.totalorder %s1832_s11, %s1889_s8 }
 0x2d8   : > { %p1212_p7 = scmp.lt.u32.totalorder %s1210_s15, %s1206_s14  ;;  %p1214_p10 = scmp.lt.u32.totalorder %s1206_s14, %s1832_s11 }
 0x2d9   : > { %p1208_p4 = pnand %p1207_p0, %p1916_p5 }
 0x2da   : > { %p1213_p11 = por %p1212_p7, %p1211_p6 }
 0x2db   : > { %p1209_p1 = pneg %p1208_p4 }
 0x2dc   : > { %p1215_p13 = por %p1214_p10, %p1213_p11 }
 0x2de   : > { %p1216_p3 = pnand %p1215_p13, %p1209_p1 }
 0x2e0   : > { %1219 = shalt.err (!%p1216_p3)
}
 0x2e1   : > { %s1303_s12 = smov 128   ;;  %s1304_s25 = smov 256  }
 0x2e2   : > { %s1305_s30 = smov 8  }
 0x2e3   : > { %1022 = dma.vmem_to_hbm [thread:$0]  (%p1916_p5), %s1835_s4, 384, %s1832_s11, %s647_s26, %s1303_s12, %s1304_s25, %s1305_s30  }
 0x2e4 PF: > { %s674_s27 = sand.u32 1, %s1264_s3   ;;  %p1917_p9 = scmp.ne.s32.totalorder %s1903_s29, 0 }
 0x2e5   : > { %p1918_p12 = scmp.ge.s32.totalorder %s1284_s22, 2  ;;  %s675_s24 = scalar_lea.sflag [#allocation11], %s674_s27 }
 0x2e7   : > { %p1033_p2 = pnand %p1918_p12, %p1917_p9 }
 0x2e9   : > { %1259 = dma.done.wait (!%p1033_p2), %s675_s24, 384  }
 0x2ea   : > { %1261 = vsyncadd (!%p1033_p2), %s675_s24, 4294966912  ;;  %s38_s22 = sadd.s32 1, %s1284_s22   ;;  %s1919_s3 = smov %s1268_s18 }
 0x2eb   : > { %p35_p8 = scmp.ge.s32.totalorder %s38_s22, 4   ;;  %s1920_s18 = smov %s1272_s19 }
 0x2ec   : > { %s1921_s19 = smov %s1485_s10  ;;  %s1922_s20 = smov %s1280_s21 }
 0x2ed   : > { %s1923_s21 = smov %s1925_s13  ;;  %37 = sbr.rel (!%p35_p8) target bundleno = 33 (0x21), region = 114 }
 0x2f4   :  { %680 = vsyncpa [#allocation10], 1 }
 0x2f5   :  { %682 = vsyncpa [#allocation10 + $0x1], 1 }
 0x2f6   :  { %683 = vsyncpa [#allocation13], 1 }
 0x2f7   :  { %685 = vsyncpa [#allocation13 + $0x1], 1 }
 0x2f8   :  { %686 = vsyncpa [#allocation11], 1 }
 0x2f9   :  { %688 = vsyncpa [#allocation11 + $0x1], 1 }

</bundles_post_ra>
